<compile_context>
chip_gen: v5e
topology: v5e:2x2
jax: 0.10.0
libtpu: 0.0.40
codegen_flags: <defaults>
</compile_context>

<pallas_src>
import numpy as np
import jax
import jax.numpy as jnp
from jax.experimental import pallas as pl
from jax.experimental.pallas import tpu as pltpu

# --------------------------- configuration (module __init__ args) ---------------------------
B = 2          # batch size
NR = 8         # num_regions
DL = 16        # local_feat_dim
DG = 24        # global_feat_dim
H = 32         # hidden_dim
L = 14         # num_labels

DLOC = NR * DL              # flattened local-feature row width (128)
DMID = (NR + 1) * H         # concat / hidden width             (288)
LPAD = 128                  # lane-dense padded label width


# ------------------------------------- parameters -------------------------------------------
def init_params(key):
    """Natural (PyTorch nn.Linear convention) parameters: y = x @ W.T + b."""
    ks = jax.random.split(key, 6)

    def nrm(k, shape, scale):
        return scale * jax.random.normal(k, shape, dtype=jnp.float32)

    return {
        "wloc": nrm(ks[0], (H, DL), 1.0 / np.sqrt(DL)),
        "bloc": nrm(ks[1], (H,), 0.01),
        "wglob": nrm(ks[2], (H, DG), 1.0 / np.sqrt(DG)),
        "bglob": nrm(ks[3], (H,), 0.01),
        "wfc": nrm(ks[4], (L, DMID), 1.0 / np.sqrt(DMID)),
        "bfc": nrm(ks[5], (L,), 0.01),
    }


def pack_params(p):
    """One-time host-side repacking into lane-dense matmul operands.

    wprojL: (NR*DL, DMID) block-diagonal -- region r's weight occupies rows
            r*DL:(r+1)*DL and columns r*H:(r+1)*H, so the local projection of
            ALL regions plus the concat are one MXU matmul on the flattened
            local-feature row.
    wprojG: (DG, DMID) -- glob_proj weight placed in the trailing H columns
            (matching the torch concat order [x_loc..., x_glob]).
    bproj : (1, DMID) fused bias for both projections.
    wfc   : (DMID, 128) fc weight transposed, zero-padded to 128 output lanes.
    bfc   : (1, 128) fc bias zero-padded to 128 lanes.
    """
    wloc_t = np.asarray(p["wloc"]).T      # (DL, H)
    wglob_t = np.asarray(p["wglob"]).T    # (DG, H)

    wprojL = np.zeros((DLOC, DMID), dtype=np.float32)
    for r in range(NR):
        wprojL[r * DL:(r + 1) * DL, r * H:(r + 1) * H] = wloc_t

    wprojG = np.zeros((DG, DMID), dtype=np.float32)
    wprojG[:, NR * H:] = wglob_t

    bproj = np.zeros((1, DMID), dtype=np.float32)
    bproj[0, :NR * H] = np.tile(np.asarray(p["bloc"]), NR)
    bproj[0, NR * H:] = np.asarray(p["bglob"])

    wfc = np.zeros((DMID, LPAD), dtype=np.float32)
    wfc[:, :L] = np.asarray(p["wfc"]).T
    bfc = np.zeros((1, LPAD), dtype=np.float32)
    bfc[0, :L] = np.asarray(p["bfc"])

    return {
        "wprojL": jnp.asarray(wprojL),
        "wprojG": jnp.asarray(wprojG),
        "bproj": jnp.asarray(bproj),
        "wfc": jnp.asarray(wfc),
        "bfc": jnp.asarray(bfc),
    }


# ------------------------------------ Pallas kernel -----------------------------------------
_GELU_C = 0.7978845608028654  # sqrt(2 / pi)


def _gelu_tanh(x):
    # TODO(synk): torch.nn.functional.gelu defaults to the exact erf formulation; the tanh
    # approximation (max deviation ~1e-3) is used since erf has no guaranteed Mosaic
    # lowering. The plain-JAX reference below uses the same formula.
    return 0.5 * x * (1.0 + jnp.tanh(_GELU_C * (x + 0.044715 * (x * x * x))))


def _mlc_v3_kernel(lf_ref, gf_ref, wl_ref, wg_ref, bproj_ref, wfc_ref, bfc_ref, out_ref):
    # Local projection of all regions + concat: (B, NR*DL) @ (NR*DL, DMID)  -- one MXU push.
    # Global projection placed in the trailing H columns: (B, DG) @ (DG, DMID).
    z = (jnp.dot(lf_ref[...], wl_ref[...], preferred_element_type=jnp.float32)
         + jnp.dot(gf_ref[...], wg_ref[...], preferred_element_type=jnp.float32)
         + bproj_ref[...])
    z = _gelu_tanh(z)
    # Final classifier, lane-dense zero-padded 128-wide output (unmasked vst).
    out_ref[...] = (jnp.dot(z, wfc_ref[...], preferred_element_type=jnp.float32)
                    + bfc_ref[...])


# --------------------------------------- wrapper --------------------------------------------
_VMEM_SPEC = pl.BlockSpec(memory_space=pltpu.MemorySpace.VMEM)


def multilabel_classifier_v3_forward(local_features, global_features, packed):
    b = local_features.shape[0]
    # Row-major contiguous reshape -> free bitcast in XLA, no per-call concat/copy.
    lf_flat = local_features.reshape(b, DLOC)                                 # (B, NR*DL)

    out = pl.pallas_call(
        _mlc_v3_kernel,
        out_shape=jax.ShapeDtypeStruct((b, LPAD), jnp.float32),
        in_specs=[_VMEM_SPEC] * 7,
        out_specs=_VMEM_SPEC,
    )(lf_flat, global_features,
      packed["wprojL"], packed["wprojG"], packed["bproj"],
      packed["wfc"], packed["bfc"])
    return out[:, :L]


# ----------------------------------- plain-JAX reference ------------------------------------
def _reference_forward(local_features, global_features, p):
    x_loc = jnp.einsum("brd,hd->brh", local_features, p["wloc"]) + p["bloc"]   # (B, NR, H)
    x_glob = global_features @ p["wglob"].T + p["bglob"]                       # (B, H)
    x = jnp.concatenate([x_loc, x_glob[:, None, :]], axis=1)                   # (B, NR+1, H)
    x = x.reshape(local_features.shape[0], -1)
    x = _gelu_tanh(x)
    return x @ p["wfc"].T + p["bfc"]                                           # (B, L)


# ------------------------------------------ main --------------------------------------------
if __name__ == "__main__":
    key = jax.random.PRNGKey(0)
    k_lf, k_gf, k_par = jax.random.split(key, 3)

    local_features = jax.random.normal(k_lf, (B, NR, DL), dtype=jnp.float32)
    global_features = jax.random.normal(k_gf, (B, DG), dtype=jnp.float32)

    params = init_params(k_par)
    packed = pack_params(params)     # one-time host-side weight repack (not per-call)

    fwd = jax.jit(multilabel_classifier_v3_forward)
    out = jax.block_until_ready(fwd(local_features, global_features, packed))
    assert out.shape == (B, L)

    ref = _reference_forward(local_features, global_features, params)
    err = float(np.max(np.abs(np.asarray(out) - np.asarray(ref))))
    assert np.allclose(np.asarray(out), np.asarray(ref), rtol=1e-3, atol=1e-3), err

    print("KERNEL_OK")
</pallas_src>

<mosaic_0001>
module attributes {stable_mosaic.version = 11 : i64} {
  func.func @_mlc_v3_kernel(%arg0: memref<2x128xf32, #tpu.memory_space<vmem>>, %arg1: memref<2x24xf32, #tpu.memory_space<vmem>>, %arg2: memref<128x288xf32, #tpu.memory_space<vmem>>, %arg3: memref<24x288xf32, #tpu.memory_space<vmem>>, %arg4: memref<1x288xf32, #tpu.memory_space<vmem>>, %arg5: memref<288x128xf32, #tpu.memory_space<vmem>>, %arg6: memref<1x128xf32, #tpu.memory_space<vmem>>, %arg7: memref<2x128xf32, #tpu.memory_space<vmem>>) attributes {dimension_semantics = [], scalar_prefetch = 0 : i64, scratch_operands = 0 : i64, tpu.core_type = #tpu.core_type<tc>} {
    %c0 = arith.constant 0 : index
    %c0_0 = arith.constant 0 : index
    %0 = vector.load %arg0[%c0, %c0_0] : memref<2x128xf32, #tpu.memory_space<vmem>>, vector<2x128xf32>
    %c0_1 = arith.constant 0 : index
    %c0_2 = arith.constant 0 : index
    %1 = vector.load %arg2[%c0_1, %c0_2] : memref<128x288xf32, #tpu.memory_space<vmem>>, vector<128x288xf32>
    %cst = arith.constant dense<0.000000e+00> : vector<2x288xf32>
    %2 = tpu.matmul %0, %1, %cst {dimension_numbers = #tpu.dot_dimension_numbers<[1], [0], [0], [1], [0, 0, 1, 1], [], []>} : vector<2x128xf32>, vector<128x288xf32>, vector<2x288xf32> -> vector<2x288xf32>
    %c0_3 = arith.constant 0 : index
    %c0_4 = arith.constant 0 : index
    %3 = vector.load %arg1[%c0_3, %c0_4] : memref<2x24xf32, #tpu.memory_space<vmem>>, vector<2x24xf32>
    %c0_5 = arith.constant 0 : index
    %c0_6 = arith.constant 0 : index
    %4 = vector.load %arg3[%c0_5, %c0_6] : memref<24x288xf32, #tpu.memory_space<vmem>>, vector<24x288xf32>
    %cst_7 = arith.constant dense<0.000000e+00> : vector<2x288xf32>
    %5 = tpu.matmul %3, %4, %cst_7 {dimension_numbers = #tpu.dot_dimension_numbers<[1], [0], [0], [1], [0, 0, 1, 1], [], []>} : vector<2x24xf32>, vector<24x288xf32>, vector<2x288xf32> -> vector<2x288xf32>
    %6 = arith.addf %2, %5 : vector<2x288xf32>
    %c0_8 = arith.constant 0 : index
    %c0_9 = arith.constant 0 : index
    %7 = vector.load %arg4[%c0_8, %c0_9] : memref<1x288xf32, #tpu.memory_space<vmem>>, vector<1x288xf32>
    %8 = vector.broadcast %7 : vector<1x288xf32> to vector<2x288xf32>
    %9 = arith.addf %6, %8 : vector<2x288xf32>
    %cst_10 = arith.constant 5.000000e-01 : f32
    %10 = vector.broadcast %cst_10 : f32 to vector<2x288xf32>
    %11 = arith.mulf %10, %9 : vector<2x288xf32>
    %12 = arith.mulf %9, %9 : vector<2x288xf32>
    %13 = arith.mulf %12, %9 : vector<2x288xf32>
    %cst_11 = arith.constant 4.471500e-02 : f32
    %14 = vector.broadcast %cst_11 : f32 to vector<2x288xf32>
    %15 = arith.mulf %14, %13 : vector<2x288xf32>
    %16 = arith.addf %9, %15 : vector<2x288xf32>
    %cst_12 = arith.constant 0.797884583 : f32
    %17 = vector.broadcast %cst_12 : f32 to vector<2x288xf32>
    %18 = arith.mulf %17, %16 : vector<2x288xf32>
    %19 = math.tanh %18 : vector<2x288xf32>
    %cst_13 = arith.constant 1.000000e+00 : f32
    %20 = vector.broadcast %cst_13 : f32 to vector<2x288xf32>
    %21 = arith.addf %20, %19 : vector<2x288xf32>
    %22 = arith.mulf %11, %21 : vector<2x288xf32>
    %c0_14 = arith.constant 0 : index
    %c0_15 = arith.constant 0 : index
    %23 = vector.load %arg5[%c0_14, %c0_15] : memref<288x128xf32, #tpu.memory_space<vmem>>, vector<288x128xf32>
    %cst_16 = arith.constant dense<0.000000e+00> : vector<2x128xf32>
    %24 = tpu.matmul %22, %23, %cst_16 {dimension_numbers = #tpu.dot_dimension_numbers<[1], [0], [0], [1], [0, 0, 1, 1], [], []>} : vector<2x288xf32>, vector<288x128xf32>, vector<2x128xf32> -> vector<2x128xf32>
    %c0_17 = arith.constant 0 : index
    %c0_18 = arith.constant 0 : index
    %25 = vector.load %arg6[%c0_17, %c0_18] : memref<1x128xf32, #tpu.memory_space<vmem>>, vector<1x128xf32>
    %26 = vector.broadcast %25 : vector<1x128xf32> to vector<2x128xf32>
    %27 = arith.addf %24, %26 : vector<2x128xf32>
    %c0_19 = arith.constant 0 : index
    %c0_20 = arith.constant 0 : index
    %28 = vector.load %arg7[%c0_19, %c0_20] : memref<2x128xf32, #tpu.memory_space<vmem>>, vector<2x128xf32>
    tpu.vector_store %arg7[%c0_19, %c0_20], %27 {strides = array<i32>} : memref<2x128xf32, #tpu.memory_space<vmem>>, vector<2x128xf32>,
    return
  }
}

</mosaic_0001>

<bundles_post_ra>
// kernel: multilabel_classifier_v3_forward.1
= control target key start
LH: loop header
LB: loop body
LE: loop exit
PB: predicated region body
PF: predicated region fallthrough
CT: control target
= control target key end

     0   :  { %vm86_vm0 = vcmask 195584   ;;  %s745_s0 = inlined_call_operand.vmem [shape: f32[2,128], index: 0, kind: input, shape index: {}]   ;;  %s746_s1 = inlined_call_operand.vmem [shape: f32[2,24], index: 1, kind: input, shape index: {}]   ;;  %s747_s2 = inlined_call_operand.vmem [shape: f32[128,288], index: 2, kind: input, shape index: {}]   ;;  %s748_s3 = inlined_call_operand.vmem [shape: f32[24,288], index: 3, kind: input, shape index: {}]   ;;  %s749_s4 = inlined_call_operand.vmem [shape: f32[1,288], index: 4, kind: input, shape index: {}]   ;;  %s750_s5 = inlined_call_operand.vmem [shape: f32[288,128], index: 5, kind: input, shape index: {}]   ;;  %s751_s6 = inlined_call_operand.vmem [shape: f32[1,128], index: 6, kind: input, shape index: {}]   ;;  %s752_s7 = inlined_call_operand.hbm [shape: f32[2,128], index: 7, kind: output, shape index: {}]  }
   0x1   :  { %v83_v0 = vld [vmem:[%s748_s3 + $0x30] sm:$0xff]  ;;  %v84_v1 = vld [vmem:[%s748_s3 + $0x38] sm:$0xff]  ;;  %v73_v2 = vld [vmem:[%s747_s2 + $0x168] sm:$0xff] }
   0x2   :  { %103 = vmatpush.msra.mxu0 %v83_v0  ;;  %123 = vmatpush.msra.mxu1 %v84_v1  ;;  %v80_v3 = vld [vmem:[%s748_s3 + $0x18] sm:$0xff]  ;;  %v81_v4 = vld [vmem:[%s748_s3 + $0x20] sm:$0xff]  ;;  %v70_v5 = vld [vmem:[%s747_s2 + $0x150] sm:$0xff] }
   0x3   :  { %150 = vmatpush.msra.mxu3 %v73_v2  ;;  %v77_v6 = vld [vmem:[%s748_s3] sm:$0xff]  ;;  %v78_v7 = vld [vmem:[%s748_s3 + $0x8] sm:$0xff]  ;;  %v67_v8 = vld [vmem:[%s747_s2 + $0x138] sm:$0xff] }
   0x4   :  { %104 = vmatpush.msra.mxu0 %v80_v3  ;;  %124 = vmatpush.msra.mxu1 %v81_v4  ;;  %v74_v9 = vld [vmem:[%s747_s2 + $0x170] sm:$0xff]  ;;  %v75_v10 = vld [vmem:[%s747_s2 + $0x178] sm:$0xff]  ;;  %v64_v11 = vld [vmem:[%s747_s2 + $0x120] sm:$0xff] }
   0x5   :  { %151 = vmatpush.msra.mxu3 %v70_v5  ;;  %v71_v12 = vld [vmem:[%s747_s2 + $0x158] sm:$0xff]  ;;  %v72_v13 = vld [vmem:[%s747_s2 + $0x160] sm:$0xff]  ;;  %v61_v14 = vld [vmem:[%s747_s2 + $0x108] sm:$0xff] }
   0x6   :  { %105 = vmatpush.msra.mxu0 %v77_v6  ;;  %125 = vmatpush.msra.mxu1 %v78_v7  ;;  %v68_v15 = vld [vmem:[%s747_s2 + $0x140] sm:$0xff]  ;;  %v69_v16 = vld [vmem:[%s747_s2 + $0x148] sm:$0xff]  ;;  %v58_v17 = vld [vmem:[%s747_s2 + $0xf0] sm:$0xff] }
   0x7   :  { %152 = vmatpush.msra.mxu3 %v67_v8  ;;  %v65_v18 = vld [vmem:[%s747_s2 + $0x128] sm:$0xff]  ;;  %v66_v19 = vld [vmem:[%s747_s2 + $0x130] sm:$0xff]  ;;  %v55_v20 = vld [vmem:[%s747_s2 + $0xd8] sm:$0xff] }
   0x8   :  { %170 = vmatpush.msrb.mxu0 %v74_v9  ;;  %190 = vmatpush.msrb.mxu1 %v75_v10  ;;  %v62_v21 = vld [vmem:[%s747_s2 + $0x110] sm:$0xff]  ;;  %v63_v22 = vld [vmem:[%s747_s2 + $0x118] sm:$0xff]  ;;  %v52_v23 = vld [vmem:[%s747_s2 + $0xc0] sm:$0xff] }
   0x9   :  { %153 = vmatpush.msra.mxu3 %v64_v11  ;;  %v59_v24 = vld [vmem:[%s747_s2 + $0xf8] sm:$0xff]  ;;  %v85_v25 = vld [vmem:[%s748_s3 + $0x40] sm:$0xff]  ;;  %v82_v27 = vld [vmem:[%s748_s3 + $0x28] sm:$0xff] }
   0xa   :  { %171 = vmatpush.msrb.mxu0 %v71_v12  ;;  %191 = vmatpush.msrb.mxu1 %v72_v13  ;;  %v60_v26 = vld [vmem:[%s747_s2 + $0x100] sm:$0xff]  ;;  %v49_v28 = vld [vmem:[%s747_s2 + $0xa8] sm:$0xff]  ;;  %v46_v32 = vld [vmem:[%s747_s2 + $0x90] sm:$0xff] }
   0xb   :  { %154 = vmatpush.msra.mxu3 %v61_v14  ;;  %v56_v29 = vld [vmem:[%s747_s2 + $0xe0] sm:$0xff]  ;;  %143 = vmatpush.msra.mxu2 %v85_v25  ;;  %v57_v30 = vld [vmem:[%s747_s2 + $0xe8] sm:$0xff]  ;;  %v54_v34 = vld [vmem:[%s747_s2 + $0xd0] sm:$0xff] }
   0xc   :  { %172 = vmatpush.msrb.mxu0 %v68_v15  ;;  %192 = vmatpush.msrb.mxu1 %v69_v16  ;;  %v76_v31 = vld [vmem:[%s746_s1] sm:$0x3]  ;;  %v53_v33 = vld [vmem:[%s747_s2 + $0xc8] sm:$0xff]  ;;  %v79_v35 = vld [vmem:[%s748_s3 + $0x10] sm:$0xff] }
   0xd   :  { %155 = vmatpush.msra.mxu3 %v58_v17  ;;  %144 = vmatpush.msra.mxu2 %v82_v27  ;;  %v43_v36 = vld [vmem:[%s747_s2 + $0x78] sm:$0xff]  ;;  %v50_v37 = vld [vmem:[%s747_s2 + $0xb0] sm:$0xff] }
   0xe   :  { %173 = vmatpush.msrb.mxu0 %v65_v18  ;;  %193 = vmatpush.msrb.mxu1 %v66_v19  ;;  %v51_v38 = vld [vmem:[%s747_s2 + $0xb8] sm:$0xff] }
   0xf   :  { %156 = vmatpush.msra.mxu3 %v55_v20  ;;  %369 = vmatmul.msk.f32.vlgmr.msra.gmra.mxu0 %vm86_vm0, %v76_v31 }
  0x10   :  { %174 = vmatpush.msrb.mxu0 %v62_v21  ;;  %194 = vmatpush.msrb.mxu1 %v63_v22 }
  0x11   :  { %157 = vmatpush.msra.mxu3 %v52_v23 }
  0x12   :  { %175 = vmatpush.msrb.mxu0 %v59_v24  ;;  %195 = vmatpush.msrb.mxu1 %v60_v26 }
  0x13   :  { %158 = vmatpush.msra.mxu3 %v49_v28 }
  0x14   :  { %176 = vmatpush.msrb.mxu0 %v56_v29  ;;  %196 = vmatpush.msrb.mxu1 %v57_v30 }
  0x15   :  { %159 = vmatpush.msra.mxu3 %v46_v32 }
  0x16   :  { %177 = vmatpush.msrb.mxu0 %v53_v33 }
  0x17   :  { %12 = vsyncpa [#allocation3], 0  ;;  %197 = vmatpush.msrb.mxu1 %v54_v34  ;;  %v40_v39 = vld [vmem:[%s747_s2 + $0x60] sm:$0xff]  ;;  %v47_v40 = vld [vmem:[%s747_s2 + $0x98] sm:$0xff]  ;;  %145 = vmatpush.msra.mxu2 %v79_v35  ;;  %vm288_vm1 = vcmask 261120   ;;  %s407_s16 = smov [#allocation2]  }
  0x18   :  { %160 = vmatpush.msra.mxu3 %v43_v36  ;;  %178 = vmatpush.msrb.mxu0 %v50_v37  ;;  %v48_v41 = vld [vmem:[%s747_s2 + $0xa0] sm:$0xff]  ;;  %v37_v42 = vld [vmem:[%s747_s2 + $0x48] sm:$0xff]  ;;  %v34_v45 = vld [vmem:[%s747_s2 + $0x30] sm:$0xff]  ;;  %s358_s17 = sshll.u32 %s407_s16, 4  ;;  %s360_s19 = sshll.u32 %s752_s7, 4  ;;  %s359_s17 = int_to_ptr.vmem [resolvable:$true] %s358_s17  ;;  %s361_s19 = int_to_ptr.hbm [resolvable:$true] %s360_s19 }
  0x19   :  { %198 = vmatpush.msrb.mxu1 %v51_v38  ;;  %v44_v43 = vld [vmem:[%s747_s2 + $0x80] sm:$0xff]  ;;  %371 = vmatmul.msk.f32.vlgmr.msra.gmra.mxu2 %vm86_vm0, %v76_v31  ;;  %v45_v44 = vld [vmem:[%s747_s2 + $0x88] sm:$0xff]  ;;  %v42_v47 = vld [vmem:[%s747_s2 + $0x70] sm:$0xff] }
  0x1a   :  { %161 = vmatpush.msra.mxu3 %v40_v39  ;;  %179 = vmatpush.msrb.mxu0 %v47_v40  ;;  %v41_v46 = vld [vmem:[%s747_s2 + $0x68] sm:$0xff]  ;;  %v31_v48 = vld [vmem:[%s747_s2 + $0x18] sm:$0xff]  ;;  %v38_v49 = vld [vmem:[%s747_s2 + $0x50] sm:$0xff] }
  0x1b   :  { %199 = vmatpush.msrb.mxu1 %v48_v41  ;;  %v39_v50 = vld [vmem:[%s747_s2 + $0x58] sm:$0xff]  ;;  %v28_v51 = vld [vmem:[%s747_s2] sm:$0xff]  ;;  %v33_v56 = vld [vmem:[%s747_s2 + $0x28] sm:$0xff] }
  0x1c   :  { %162 = vmatpush.msra.mxu3 %v37_v42  ;;  %180 = vmatpush.msrb.mxu0 %v44_v43  ;;  %v27_v52 = vld [vmem:[%s745_s0] sm:$0x3]  ;;  %v35_v53 = vld [vmem:[%s747_s2 + $0x38] sm:$0xff]  ;;  %v29_v57 = vld [vmem:[%s747_s2 + $0x8] sm:$0xff] }
  0x1d   :  { %200 = vmatpush.msrb.mxu1 %v45_v44  ;;  %v36_v54 = vld [vmem:[%s747_s2 + $0x40] sm:$0xff]  ;;  %v30_v58 = vld [vmem:[%s747_s2 + $0x10] sm:$0xff]  ;;  %v279_v59 = vld [vmem:[%s750_s5 + $0xf8] sm:$0xff] }
  0x1e   :  { %163 = vmatpush.msra.mxu3 %v34_v45  ;;  %181 = vmatpush.msrb.mxu0 %v41_v46  ;;  %v32_v55 = vld [vmem:[%s747_s2 + $0x20] sm:$0xff]  ;;  %v263_v60 = vld [vmem:[%s750_s5 + $0x78] sm:$0xff]  ;;  %v278_v61 = vld [vmem:[%s750_s5 + $0xf0] sm:$0xff] }
  0x1f   :  { %201 = vmatpush.msrb.mxu1 %v42_v47  ;;  %292 = vmatpush.msrb.mxu2 %v263_v60  ;;  %v262_v62 = vld [vmem:[%s750_s5 + $0x70] sm:$0xff]  ;;  %v277_v63 = vld [vmem:[%s750_s5 + $0xe8] sm:$0xff]  ;;  %v276_v1 = vld [vmem:[%s750_s5 + $0xe0] sm:$0xff] }
  0x20   :  { %370 = vmatmul.msk.f32.vlgmr.msra.gmra.mxu1 %vm86_vm0, %v76_v31  ;;  %164 = vmatpush.msra.mxu3 %v31_v48  ;;  %v261_v0 = vld [vmem:[%s750_s5 + $0x68] sm:$0xff]  ;;  %v260_v2 = vld [vmem:[%s750_s5 + $0x60] sm:$0xff]  ;;  %v275_v3 = vld [vmem:[%s750_s5 + $0xd8] sm:$0xff] }
  0x21   :  { %182 = vmatpush.msrb.mxu0 %v38_v49  ;;  %202 = vmatpush.msrb.mxu1 %v39_v50  ;;  %v259_v4 = vld [vmem:[%s750_s5 + $0x58] sm:$0xff]  ;;  %v274_v5 = vld [vmem:[%s750_s5 + $0xd0] sm:$0xff]  ;;  %v273_v7 = vld [vmem:[%s750_s5 + $0xc8] sm:$0xff] }
  0x22   :  { %165 = vmatpush.msra.mxu3 %v28_v51  ;;  %293 = vmatpush.msrb.mxu2 %v262_v62  ;;  %v258_v6 = vld [vmem:[%s750_s5 + $0x50] sm:$0xff]  ;;  %v257_v8 = vld [vmem:[%s750_s5 + $0x48] sm:$0xff]  ;;  %v272_v9 = vld [vmem:[%s750_s5 + $0xc0] sm:$0xff] }
  0x23   :  { %166 = vmatmul.f32.vlgmr.msra.gmra.mxu3 %v27_v52  ;;  %183 = vmatpush.msrb.mxu0 %v35_v53  ;;  %v256_v10 = vld [vmem:[%s750_s5 + $0x40] sm:$0xff]  ;;  %v271_v11 = vld [vmem:[%s750_s5 + $0xb8] sm:$0xff]  ;;  %v270_v13 = vld [vmem:[%s750_s5 + $0xb0] sm:$0xff] }
  0x24   :  { %203 = vmatpush.msrb.mxu1 %v36_v54  ;;  %312 = vmatpush.msrb.mxu3 %v279_v59  ;;  %v255_v12 = vld [vmem:[%s750_s5 + $0x38] sm:$0xff]  ;;  %v254_v14 = vld [vmem:[%s750_s5 + $0x30] sm:$0xff]  ;;  %v269_v15 = vld [vmem:[%s750_s5 + $0xa8] sm:$0xff] }
  0x25   :  { %184 = vmatpush.msrb.mxu0 %v32_v55  ;;  %294 = vmatpush.msrb.mxu2 %v261_v0  ;;  %v253_v16 = vld [vmem:[%s750_s5 + $0x28] sm:$0xff]  ;;  %v268_v17 = vld [vmem:[%s750_s5 + $0xa0] sm:$0xff]  ;;  %v267_v19 = vld [vmem:[%s750_s5 + $0x98] sm:$0xff] }
  0x26   :  { %204 = vmatpush.msrb.mxu1 %v33_v56  ;;  %313 = vmatpush.msrb.mxu3 %v278_v61  ;;  %v252_v18 = vld [vmem:[%s750_s5 + $0x20] sm:$0xff]  ;;  %v283_v20 = vld [vmem:[%s750_s5 + $0x118] sm:$0xff]  ;;  %v266_v22 = vld [vmem:[%s750_s5 + $0x90] sm:$0xff] }
  0x27   :  { %185 = vmatpush.msrb.mxu0 %v29_v57  ;;  %295 = vmatpush.msrb.mxu2 %v260_v2  ;;  %v251_v21 = vld [vmem:[%s750_s5 + $0x18] sm:$0xff]  ;;  %v282_v23 = vld [vmem:[%s750_s5 + $0x110] sm:$0xff]  ;;  %v265_v26 = vld [vmem:[%s750_s5 + $0x88] sm:$0xff] }
  0x28   :  { %205 = vmatpush.msrb.mxu1 %v30_v58  ;;  %186 = vmatmul.f32.vlgmr.msrb.gmra.mxu0 %v27_v52  ;;  %v250_v25 = vld [vmem:[%s750_s5 + $0x10] sm:$0xff]  ;;  %v281_v27 = vld [vmem:[%s750_s5 + $0x108] sm:$0xff]  ;;  %v264_v30 = vld [vmem:[%s750_s5 + $0x80] sm:$0xff] }
  0x29   :  { %206 = vmatmul.f32.vlgmr.msrb.gmra.mxu1 %v27_v52  ;;  %314 = vmatpush.msrb.mxu3 %v277_v63  ;;  %v249_v28 = vld [vmem:[%s750_s5 + $0x8] sm:$0xff]  ;;  %v280_v31 = vld [vmem:[%s750_s5 + $0x100] sm:$0xff] }
  0x2a   :  { %296 = vmatpush.msrb.mxu2 %v259_v4  ;;  %344 = vmatpush.msra.mxu0 %v283_v20  ;;  %v248_v32 = vld [vmem:[%s750_s5] sm:$0xff] }
  0x2b   :  { %315 = vmatpush.msrb.mxu3 %v276_v1  ;;  %v210_v33 = vld [vmem:[%s749_s4] sm:$0x7] }
  0x2c   :  { %297 = vmatpush.msrb.mxu2 %v258_v6  ;;  %345 = vmatpush.msra.mxu0 %v282_v23  ;;  %v213_v35 = vperm.slane %v210_v33, 1  ;;  %v214_v37 = vperm.slane %v210_v33, 2  ;;  %v212_v38 = vperm.slane %v210_v33, 0 }
  0x2d   :  { %316 = vmatpush.msrb.mxu3 %v275_v3 }
  0x2e   :  { %298 = vmatpush.msrb.mxu2 %v257_v8  ;;  %346 = vmatpush.msra.mxu0 %v281_v27 }
  0x2f   :  { %317 = vmatpush.msrb.mxu3 %v274_v5 }
  0x30   :  { %299 = vmatpush.msrb.mxu2 %v256_v10  ;;  %347 = vmatpush.msra.mxu0 %v280_v31  ;;  %v374_v10 = vld [vmem:[%s751_s6] ss:$0 sm:$0xff] }
  0x31   :  { %318 = vmatpush.msrb.mxu3 %v273_v7 }
  0x32   :  { %300 = vmatpush.msrb.mxu2 %v255_v12 }
  0x33   :  { %319 = vmatpush.msrb.mxu3 %v272_v9 }
  0x34   :  { %301 = vmatpush.msrb.mxu2 %v254_v14 }
  0x35   :  { %320 = vmatpush.msrb.mxu3 %v271_v11 }
  0x36   :  { %302 = vmatpush.msrb.mxu2 %v253_v16 }
  0x37   :  { %321 = vmatpush.msrb.mxu3 %v270_v13 }
  0x38   :  { %303 = vmatpush.msrb.mxu2 %v252_v18 }
  0x39   :  { %322 = vmatpush.msrb.mxu3 %v269_v15 }
  0x3a   :  { %304 = vmatpush.msrb.mxu2 %v251_v21 }
  0x3b   :  { %323 = vmatpush.msrb.mxu3 %v268_v17 }
  0x3c   :  { %305 = vmatpush.msrb.mxu2 %v250_v25 }
  0x3d   :  { %324 = vmatpush.msrb.mxu3 %v267_v19 }
  0x3e   :  { %306 = vmatpush.msrb.mxu2 %v249_v28 }
  0x3f   :  { %325 = vmatpush.msrb.mxu3 %v266_v22 }
  0x40   :  { %307 = vmatpush.msrb.mxu2 %v248_v32 }
  0x41   :  { %326 = vmatpush.msrb.mxu3 %v265_v26 }
  0x43   :  { %327 = vmatpush.msrb.mxu3 %v264_v30 }
  0x8c   :  { %v107_v24 = vpop.f32.mrf.mxu0 }
  0x9c   :  { %v147_v34 = vpop.f32.mrf.mxu2 }
  0x9d   :  { %v127_v29 = vpop.f32.mrf.mxu1 }
  0xa5   :  { %v187_v36 = vpop.f32.mrf.mxu0 }
  0xa6   :  { %v188_v39 = vadd.f32 %v187_v36, %v127_v29  ;;  %v207_v40 = vpop.f32.mrf.mxu1  ;;  %v167_v41 = vpop.f32.mrf.mxu3 }
  0xa7   :  { %v208_v42 = vadd.f32 %v207_v40, %v147_v34  ;;  %v168_v43 = vadd.f32 %v167_v41, %v107_v24 }
  0xa8   :  { %v219_v44 = vadd.f32 %v213_v35, %v188_v39 }
  0xa9   :  { %v220_v45 = vadd.f32 %v214_v37, %v208_v42  ;;  %v218_v46 = vadd.f32 %v212_v38, %v168_v43 }
  0xaa   :  { %v225_v47 = vmul.f32 %v219_v44, %v219_v44  ;;  %v222_v0 = vmul.f32 0.5, %v219_v44 }
  0xab   :  { %v226_v48 = vmul.f32 %v220_v45, %v220_v45  ;;  %v224_v49 = vmul.f32 %v218_v46, %v218_v46  ;;  %v223_v3 = vmul.f32 0.5, %v220_v45  ;;  %v221_v6 = vmul.f32 0.5, %v218_v46 }
  0xac   :  { %v228_v50 = vmul.f32 %v225_v47, %v219_v44 }
  0xad   :  { %v229_v51 = vmul.f32 %v226_v48, %v220_v45  ;;  %v227_v52 = vmul.f32 %v224_v49, %v218_v46 }
  0xae   :  { %v231_v53 = vmul.f32 0.044715, %v228_v50 }
  0xaf   :  { %v232_v54 = vmul.f32 0.044715, %v229_v51  ;;  %v230_v55 = vmul.f32 0.044715, %v227_v52 }
  0xb0   :  { %v234_v56 = vadd.f32 %v231_v53, %v219_v44 }
  0xb1   :  { %v235_v57 = vadd.f32 %v232_v54, %v220_v45  ;;  %v233_v58 = vadd.f32 %v230_v55, %v218_v46 }
  0xb2   :  { %v237_v59 = vmul.f32 0.7978846, %v234_v56 }
  0xb3   :  { %v238_v60 = vmul.f32 0.7978846, %v235_v57  ;;  %v236_v61 = vmul.f32 0.7978846, %v233_v58 }
  0xb4   :  { %375 = vtanh.f32 %v237_v59 }
  0xb5   :  { %377 = vtanh.f32 %v238_v60 }
  0xb6   :  { %379 = vtanh.f32 %v236_v61 }
  0xba   :  { %v376_v62 = vpop.eup %375 }
  0xbb   :  { %v378_v63 = vpop.eup %377  ;;  %v243_v1 = vadd.f32 1.0, %v376_v62 }
  0xbc   :  { %v380_v2 = vpop.eup %379  ;;  %v244_v4 = vadd.f32 1.0, %v378_v63 }
  0xbd   :  { %v246_v5 = vmul.f32 %v243_v1, %v222_v0  ;;  %v242_v7 = vadd.f32 1.0, %v380_v2 }
  0xbe   :  { %v247_v8 = vmul.f32 %v244_v4, %v223_v3 }
  0xbf   :  { %328 = vmatmul.f32.vlgmr.msrb.gmra.mxu3 %v246_v5  ;;  %v245_v9 = vmul.f32 %v242_v7, %v221_v6 }
  0xc0   :  { %372 = vmatmul.msk.f32.vlgmr.msra.gmra.mxu0 %vm288_vm1, %v247_v8 }
  0xc1   :  { %308 = vmatmul.f32.vlgmr.msrb.gmra.mxu2 %v245_v9 }
 0x13d   :  { %v349_v15 = vpop.f32.mrf.mxu0 }
 0x142   :  { %v329_v13 = vpop.f32.mrf.mxu3 }
 0x144   :  { %v309_v11 = vpop.f32.mrf.mxu2 }
 0x145   :  { %v310_v12 = vadd.f32 %v374_v10, %v309_v11 }
 0x147   :  { %v330_v14 = vadd.f32 %v329_v13, %v310_v12 }
 0x149   :  { %v350_v16 = vadd.f32 %v349_v15, %v330_v14 }
 0x14b   :  { %352 = vst [vmem:[#allocation2] sm:$0x3] %v350_v16 }
 0x14c   :  { %363 = dma.vmem_to_hbm [thread:$0]  %s359_s17, 32, %s361_s19, [#allocation3]  }
 0x14d   :  { %405 = dma.done.wait [#allocation3], 32  }
 0x14e   :  { %406 = vsyncadd [#allocation3], 4294967264 }
 0x14f   :  { %368 = vsyncpa [#allocation3], 1 }

</bundles_post_ra>
